<compile_context>
chip_gen: v6e
topology: v6e:2x2x1
jax: 0.10.0
libtpu: 0.0.40
codegen_flags: <defaults>
</compile_context>

<pallas_src>
import functools
import math

import jax
import jax.numpy as jnp
from jax import lax
from jax.experimental import pallas as pl
from jax.experimental.pallas import tpu as pltpu


def _round_up(v, m):
    return ((v + m - 1) // m) * m


def _newton_recip(d):
    """EUP approx reciprocal + one Newton step (VALU) -> ~f32-accurate 1/d."""
    inv = pl.reciprocal(d, approx=True)
    return inv * (2.0 - d * inv)


def _memory_block_kernel(
    x_ref, mem_t_ref, mem_ref, out_ref, *, inv_tem, shrink_thres, valid_mem
):
    # x tile: (TILE_N, Z_P); resident mem_t: (Z_P, M_P); resident mem: (M_P, Z_P)
    feed_dtype = mem_t_ref.dtype

    # Fold temperature into the small operand once, in f32, before the MXU feed.
    x = x_ref[...].astype(jnp.float32) * jnp.float32(inv_tem)

    # att = (x / tem) @ mem.T  -- natural (M,K)x(K,N), no transpose of the bank.
    att = lax.dot_general(
        x.astype(feed_dtype),
        mem_t_ref[...],
        dimension_numbers=(((1,), (0,)), ((), ())),
        preferred_element_type=jnp.float32,
    )  # (TILE_N, M_P) f32

    m_p = att.shape[1]
    if valid_mem < m_p:
        # Padded memory slots must get zero softmax weight.
        col_ids = lax.broadcasted_iota(jnp.int32, att.shape, 1)
        att = jnp.where(col_ids < valid_mem, att, jnp.float32(-1e30))

    # Numerically stable softmax over the memory axis.
    att_max = jnp.max(att, axis=1, keepdims=True)
    e = jnp.exp(att - att_max)
    att = e * _newton_recip(jnp.sum(e, axis=1, keepdims=True))

    if shrink_thres > 0:
        # hard_shrink_relu: relu(a-l) * a / (|a-l| + eps).
        # The numerator is 0 whenever a < l, so |a-l| can be replaced by
        # relu(a-l); the divide becomes an approx reciprocal + Newton step.
        eps = 1e-12
        r = jnp.maximum(att - jnp.float32(shrink_thres), 0.0)
        att = att * r * _newton_recip(r + eps)
        # F.normalize(p=1, dim=1); att >= 0 after the shrink, so sum == L1.
        l1 = jnp.maximum(jnp.sum(att, axis=1, keepdims=True), 1e-12)
        att = att * _newton_recip(l1)

    # out = att @ mem  -- natural orientation again.
    out = lax.dot_general(
        att.astype(feed_dtype),
        mem_ref[...],
        dimension_numbers=(((1,), (0,)), ((), ())),
        preferred_element_type=jnp.float32,
    )  # (TILE_N, Z_P)
    out_ref[...] = out.astype(out_ref.dtype)


# Conservative across generations: leaves plenty of headroom inside v7x's
# 64 MiB/TC physical VMEM (v5e/v6e have 128 MiB).
_VMEM_BUDGET_BYTES = 40 << 20


def memory_block_forward(
    x,
    mem,
    *,
    tem=0.5,
    shrink_thres=0.005,
    tile_n=512,
    use_bf16_matmul=False,
    io_dtype=None,
):
    """x: (N, z_dim), mem: (mem_dim, z_dim) -> (N, z_dim)."""
    n, z_dim = x.shape
    mem_dim, z_dim2 = mem.shape
    assert z_dim == z_dim2

    io_dtype = jnp.dtype(io_dtype) if io_dtype is not None else jnp.dtype(x.dtype)
    mem_dtype = jnp.dtype(jnp.bfloat16) if use_bf16_matmul else jnp.dtype(jnp.float32)

    # Lane-dense padding: last dims to multiples of 128 (unmasked vst, full
    # MXU lane occupancy on all generations).
    z_p = _round_up(z_dim, 128)
    m_p = _round_up(mem_dim, 128)

    # --- choose TILE_N -------------------------------------------------------
    n_pad8 = _round_up(n, 8)
    # Keep >= 2 grid steps when possible so the "parallel" N axis actually
    # shards across both TensorCores on v7x (neutral on v5e/v6e).
    half_cap = max(8, _round_up((n_pad8 + 1) // 2, 8))
    tile_n = max(8, min(_round_up(tile_n, 8), half_cap))

    io_bytes = io_dtype.itemsize
    mem_bytes = mem_dtype.itemsize

    def vmem_estimate(t):
        return (
            2 * t * z_p * io_bytes      # x tile, double-buffered
            + 2 * t * z_p * io_bytes    # out tile, double-buffered
            + 2 * m_p * z_p * mem_bytes  # mem + mem_t, single-buffered residents
            + 4 * t * m_p * 4           # f32 softmax / shrink temporaries
        )

    while tile_n > 8 and vmem_estimate(tile_n) > _VMEM_BUDGET_BYTES:
        tile_n = max(8, _round_up(tile_n // 2, 8))

    n_p = _round_up(n, tile_n)
    grid = (n_p // tile_n,)

    x_p = jnp.pad(x.astype(io_dtype), ((0, n_p - n), (0, z_p - z_dim)))
    mem_p = jnp.pad(mem.astype(mem_dtype), ((0, m_p - mem_dim), (0, z_p - z_dim)))
    mem_t_p = jnp.pad(mem.T.astype(mem_dtype), ((0, z_p - z_dim), (0, m_p - mem_dim)))

    kernel = functools.partial(
        _memory_block_kernel,
        inv_tem=1.0 / tem,
        shrink_thres=shrink_thres,
        valid_mem=mem_dim,
    )

    flops = 2 * 2 * n_p * m_p * z_p               # two matmuls
    bytes_accessed = 2 * n_p * z_p * io_bytes + 2 * m_p * z_p * mem_bytes
    transcendentals = n_p * m_p + 6 * n_p          # exp + approx reciprocals

    vmem_limit = int(
        min(max(vmem_estimate(tile_n) * 3 // 2 + (2 << 20), 32 << 20), 64 << 20)
    )

    def build(single_buffer_mem):
        if single_buffer_mem:
            mem_t_spec = pl.BlockSpec(
                (z_p, m_p), lambda i: (0, 0), pipeline_mode=pl.Buffered(1)
            )
            mem_spec = pl.BlockSpec(
                (m_p, z_p), lambda i: (0, 0), pipeline_mode=pl.Buffered(1)
            )
        else:
            mem_t_spec = pl.BlockSpec((z_p, m_p), lambda i: (0, 0))
            mem_spec = pl.BlockSpec((m_p, z_p), lambda i: (0, 0))
        return pl.pallas_call(
            kernel,
            out_shape=jax.ShapeDtypeStruct((n_p, z_p), io_dtype),
            grid=grid,
            in_specs=[
                pl.BlockSpec((tile_n, z_p), lambda i: (i, 0)),
                mem_t_spec,  # resident bank, (Z_P, M_P) for the first matmul
                mem_spec,    # resident bank, (M_P, Z_P) for the second matmul
            ],
            out_specs=pl.BlockSpec((tile_n, z_p), lambda i: (i, 0)),
            compiler_params=pltpu.CompilerParams(
                dimension_semantics=("parallel",),  # shard N across TCs on v7x
                vmem_limit_bytes=vmem_limit,
            ),
            cost_estimate=pl.CostEstimate(
                flops=flops,
                transcendentals=transcendentals,
                bytes_accessed=bytes_accessed,
            ),
        )

    try:
        out_p = build(single_buffer_mem=True)(x_p, mem_t_p, mem_p)
    except Exception:
        # Fallback for runtimes that reject single-buffered resident inputs;
        # only costs one extra copy of the (small) memory bank in VMEM.
        out_p = build(single_buffer_mem=False)(x_p, mem_t_p, mem_p)

    return out_p[:n, :z_dim]


def _reference(x, mem, *, tem=0.5, shrink_thres=0.005):
    att = jnp.dot(x, mem.T) / tem
    att = jax.nn.softmax(att, axis=1)
    if shrink_thres > 0:
        eps = 1e-12
        shifted = att - shrink_thres
        att = (jnp.maximum(shifted, 0.0) * att) / (jnp.abs(shifted) + eps)
        att = att / jnp.maximum(jnp.sum(jnp.abs(att), axis=1, keepdims=True), 1e-12)
    return jnp.dot(att, mem)


if __name__ == "__main__":
    # Small shapes consistent with the module's forward: input (N, z_dim).
    N, MEM_DIM, Z_DIM = 24, 64, 32
    TEM, SHRINK_THRES = 0.5, 0.005

    key = jax.random.PRNGKey(0)
    k_mem, k_x = jax.random.split(key)

    # reset_parameters(): mem ~ Uniform(-stdv, stdv), stdv = 1/sqrt(z_dim)
    stdv = 1.0 / math.sqrt(Z_DIM)
    mem = jax.random.uniform(
        k_mem, (MEM_DIM, Z_DIM), dtype=jnp.float32, minval=-stdv, maxval=stdv
    )
    x = jax.random.normal(k_x, (N, Z_DIM), dtype=jnp.float32)

    # Default tile_n (512) is clamped to keep a 2-step grid for N=24, which
    # exercises the resident-bank pipelining and the multi-step N axis.
    out = memory_block_forward(x, mem, tem=TEM, shrink_thres=SHRINK_THRES)
    out = jax.block_until_ready(out)

    ref = _reference(x, mem, tem=TEM, shrink_thres=SHRINK_THRES)
    assert out.shape == (N, Z_DIM)
    assert jnp.allclose(out, ref, atol=2e-5, rtol=2e-5), "mismatch vs reference"

    print("KERNEL_OK")
</pallas_src>

<mosaic_0001>
module attributes {stable_mosaic.version = 11 : i64} {
  func.func @_memory_block_kernel(%arg0: i32, %arg1: memref<16x128xf32, #tpu.memory_space<vmem>>, %arg2: memref<128x128xf32, #tpu.memory_space<vmem>>, %arg3: memref<128x128xf32, #tpu.memory_space<vmem>>, %arg4: memref<16x128xf32, #tpu.memory_space<vmem>>) attributes {dimension_semantics = [#tpu.dimension_semantics<parallel>], iteration_bounds = array<i64: 2>, scalar_prefetch = 0 : i64, scratch_operands = 0 : i64, tpu.core_type = #tpu.core_type<tc>, window_params = [{transform_indices = @transform_0, window_bounds = array<i64: 16, 128>}, {pipeline_mode = #tpu.pipeline_mode<synchronous>, transform_indices = @transform_1, window_bounds = array<i64: 128, 128>}, {pipeline_mode = #tpu.pipeline_mode<synchronous>, transform_indices = @transform_2, window_bounds = array<i64: 128, 128>}, {transform_indices = @transform_3, window_bounds = array<i64: 16, 128>}]} {
    %c0 = arith.constant 0 : index
    %c0_0 = arith.constant 0 : index
    %0 = vector.load %arg1[%c0, %c0_0] : memref<16x128xf32, #tpu.memory_space<vmem>>, vector<16x128xf32>
    %cst = arith.constant 2.000000e+00 : f32
    %1 = vector.broadcast %cst : f32 to vector<16x128xf32>
    %2 = arith.mulf %0, %1 : vector<16x128xf32>
    %c0_1 = arith.constant 0 : index
    %c0_2 = arith.constant 0 : index
    %3 = vector.load %arg2[%c0_1, %c0_2] : memref<128x128xf32, #tpu.memory_space<vmem>>, vector<128x128xf32>
    %cst_3 = arith.constant dense<0.000000e+00> : vector<16x128xf32>
    %4 = tpu.matmul %2, %3, %cst_3 {dimension_numbers = #tpu.dot_dimension_numbers<[1], [0], [0], [1], [0, 0, 1, 1], [], []>} : vector<16x128xf32>, vector<128x128xf32>, vector<16x128xf32> -> vector<16x128xf32>
    %5 = tpu.iota {dimensions = array<i32: 1>} : vector<16x128xi32>
    %c64_i32 = arith.constant 64 : i32
    %6 = vector.broadcast %c64_i32 : i32 to vector<16x128xi32>
    %7 = arith.cmpi slt, %5, %6 : vector<16x128xi32>
    %cst_4 = arith.constant -1.000000e+30 : f32
    %8 = vector.broadcast %cst_4 : f32 to vector<16x128xf32>
    %9 = arith.select %7, %4, %8 : vector<16x128xi1>, vector<16x128xf32>
    %cst_5 = arith.constant dense<0xFF800000> : vector<16xf32>
    %10 = vector.multi_reduction <maximumf>, %9, %cst_5 [1] : vector<16x128xf32> to vector<16xf32>
    %11 = vector.shape_cast %10 : vector<16xf32> to vector<16x1xf32>
    %12 = vector.broadcast %11 : vector<16x1xf32> to vector<16x128xf32>
    %13 = arith.subf %9, %12 : vector<16x128xf32>
    %14 = math.exp %13 : vector<16x128xf32>
    %cst_6 = arith.constant dense<0.000000e+00> : vector<16xf32>
    %15 = vector.multi_reduction <add>, %14, %cst_6 [1] : vector<16x128xf32> to vector<16xf32>
    %16 = vector.shape_cast %15 : vector<16xf32> to vector<16x1xf32>
    %17 = tpu.reciprocal %16 {approx = true} : vector<16x1xf32> -> vector<16x1xf32>
    %18 = arith.mulf %16, %17 : vector<16x1xf32>
    %cst_7 = arith.constant 2.000000e+00 : f32
    %19 = vector.broadcast %cst_7 : f32 to vector<16x1xf32>
    %20 = arith.subf %19, %18 : vector<16x1xf32>
    %21 = arith.mulf %17, %20 : vector<16x1xf32>
    %22 = vector.broadcast %21 : vector<16x1xf32> to vector<16x128xf32>
    %23 = arith.mulf %14, %22 : vector<16x128xf32>
    %cst_8 = arith.constant 5.000000e-03 : f32
    %24 = vector.broadcast %cst_8 : f32 to vector<16x128xf32>
    %25 = arith.subf %23, %24 : vector<16x128xf32>
    %cst_9 = arith.constant 0.000000e+00 : f32
    %26 = vector.broadcast %cst_9 : f32 to vector<16x128xf32>
    %27 = arith.maximumf %25, %26 : vector<16x128xf32>
    %28 = arith.mulf %23, %27 : vector<16x128xf32>
    %cst_10 = arith.constant 9.99999996E-13 : f32
    %29 = vector.broadcast %cst_10 : f32 to vector<16x128xf32>
    %30 = arith.addf %27, %29 : vector<16x128xf32>
    %31 = tpu.reciprocal %30 {approx = true} : vector<16x128xf32> -> vector<16x128xf32>
    %32 = arith.mulf %30, %31 : vector<16x128xf32>
    %cst_11 = arith.constant 2.000000e+00 : f32
    %33 = vector.broadcast %cst_11 : f32 to vector<16x128xf32>
    %34 = arith.subf %33, %32 : vector<16x128xf32>
    %35 = arith.mulf %31, %34 : vector<16x128xf32>
    %36 = arith.mulf %28, %35 : vector<16x128xf32>
    %cst_12 = arith.constant dense<0.000000e+00> : vector<16xf32>
    %37 = vector.multi_reduction <add>, %36, %cst_12 [1] : vector<16x128xf32> to vector<16xf32>
    %38 = vector.shape_cast %37 : vector<16xf32> to vector<16x1xf32>
    %cst_13 = arith.constant 9.99999996E-13 : f32
    %39 = vector.broadcast %cst_13 : f32 to vector<16x1xf32>
    %40 = arith.maximumf %38, %39 : vector<16x1xf32>
    %41 = tpu.reciprocal %40 {approx = true} : vector<16x1xf32> -> vector<16x1xf32>
    %42 = arith.mulf %40, %41 : vector<16x1xf32>
    %cst_14 = arith.constant 2.000000e+00 : f32
    %43 = vector.broadcast %cst_14 : f32 to vector<16x1xf32>
    %44 = arith.subf %43, %42 : vector<16x1xf32>
    %45 = arith.mulf %41, %44 : vector<16x1xf32>
    %46 = vector.broadcast %45 : vector<16x1xf32> to vector<16x128xf32>
    %47 = arith.mulf %36, %46 : vector<16x128xf32>
    %c0_15 = arith.constant 0 : index
    %c0_16 = arith.constant 0 : index
    %48 = vector.load %arg3[%c0_15, %c0_16] : memref<128x128xf32, #tpu.memory_space<vmem>>, vector<128x128xf32>
    %cst_17 = arith.constant dense<0.000000e+00> : vector<16x128xf32>
    %49 = tpu.matmul %47, %48, %cst_17 {dimension_numbers = #tpu.dot_dimension_numbers<[1], [0], [0], [1], [0, 0, 1, 1], [], []>} : vector<16x128xf32>, vector<128x128xf32>, vector<16x128xf32> -> vector<16x128xf32>
    %c0_18 = arith.constant 0 : index
    %c0_19 = arith.constant 0 : index
    %50 = vector.load %arg4[%c0_18, %c0_19] : memref<16x128xf32, #tpu.memory_space<vmem>>, vector<16x128xf32>
    tpu.vector_store %arg4[%c0_18, %c0_19], %49 {strides = array<i32>} : memref<16x128xf32, #tpu.memory_space<vmem>>, vector<16x128xf32>,
    return
  }
  func.func @transform_0(%arg0: i32) -> (i32, i32) {
    %c0_i32 = arith.constant 0 : i32
    %c0_i32_0 = arith.constant 0 : i32
    return %arg0, %c0_i32 : i32, i32
  }
  func.func @transform_1(%arg0: i32) -> (i32, i32) {
    %c0_i32 = arith.constant 0 : i32
    %c0_i32_0 = arith.constant 0 : i32
    %c0_i32_1 = arith.constant 0 : i32
    return %c0_i32, %c0_i32_0 : i32, i32
  }
  func.func @transform_2(%arg0: i32) -> (i32, i32) {
    %c0_i32 = arith.constant 0 : i32
    %c0_i32_0 = arith.constant 0 : i32
    %c0_i32_1 = arith.constant 0 : i32
    return %c0_i32, %c0_i32_0 : i32, i32
  }
  func.func @transform_3(%arg0: i32) -> (i32, i32) {
    %c0_i32 = arith.constant 0 : i32
    %c0_i32_0 = arith.constant 0 : i32
    return %arg0, %c0_i32 : i32, i32
  }
}

module attributes {stable_mosaic.version = 11 : i64} {
  func.func @_memory_block_kernel(%arg0: i32, %arg1: memref<16x128xf32, #tpu.memory_space<vmem>>, %arg2: memref<128x128xf32, #tpu.memory_space<vmem>>, %arg3: memref<128x128xf32, #tpu.memory_space<vmem>>, %arg4: memref<16x128xf32, #tpu.memory_space<vmem>>) attributes {dimension_semantics = [#tpu.dimension_semantics<parallel>], iteration_bounds = array<i64: 2>, scalar_prefetch = 0 : i64, scratch_operands = 0 : i64, tpu.core_type = #tpu.core_type<tc>, window_params = [{transform_indices = @transform_0, window_bounds = array<i64: 16, 128>}, {pipeline_mode = #tpu.pipeline_mode<synchronous>, transform_indices = @transform_1, window_bounds = array<i64: 128, 128>}, {pipeline_mode = #tpu.pipeline_mode<synchronous>, transform_indices = @transform_2, window_bounds = array<i64: 128, 128>}, {transform_indices = @transform_3, window_bounds = array<i64: 16, 128>}]} {
    %c0 = arith.constant 0 : index
    %c0_0 = arith.constant 0 : index
    %0 = vector.load %arg1[%c0, %c0_0] : memref<16x128xf32, #tpu.memory_space<vmem>>, vector<16x128xf32>
    %cst = arith.constant 2.000000e+00 : f32
    %1 = vector.broadcast %cst : f32 to vector<16x128xf32>
    %2 = arith.mulf %0, %1 : vector<16x128xf32>
    %c0_1 = arith.constant 0 : index
    %c0_2 = arith.constant 0 : index
    %3 = vector.load %arg2[%c0_1, %c0_2] : memref<128x128xf32, #tpu.memory_space<vmem>>, vector<128x128xf32>
    %cst_3 = arith.constant dense<0.000000e+00> : vector<16x128xf32>
    %4 = tpu.matmul %2, %3, %cst_3 {dimension_numbers = #tpu.dot_dimension_numbers<[1], [0], [0], [1], [0, 0, 1, 1], [], []>} : vector<16x128xf32>, vector<128x128xf32>, vector<16x128xf32> -> vector<16x128xf32>
    %5 = tpu.iota {dimensions = array<i32: 1>} : vector<16x128xi32>
    %c64_i32 = arith.constant 64 : i32
    %6 = vector.broadcast %c64_i32 : i32 to vector<16x128xi32>
    %7 = arith.cmpi slt, %5, %6 : vector<16x128xi32>
    %cst_4 = arith.constant -1.000000e+30 : f32
    %8 = vector.broadcast %cst_4 : f32 to vector<16x128xf32>
    %9 = arith.select %7, %4, %8 : vector<16x128xi1>, vector<16x128xf32>
    %cst_5 = arith.constant dense<0xFF800000> : vector<16xf32>
    %10 = vector.multi_reduction <maximumf>, %9, %cst_5 [1] : vector<16x128xf32> to vector<16xf32>
    %11 = vector.shape_cast %10 : vector<16xf32> to vector<16x1xf32>
    %12 = vector.broadcast %11 : vector<16x1xf32> to vector<16x128xf32>
    %13 = arith.subf %9, %12 : vector<16x128xf32>
    %14 = math.exp %13 : vector<16x128xf32>
    %cst_6 = arith.constant dense<0.000000e+00> : vector<16xf32>
    %15 = vector.multi_reduction <add>, %14, %cst_6 [1] : vector<16x128xf32> to vector<16xf32>
    %16 = vector.shape_cast %15 : vector<16xf32> to vector<16x1xf32>
    %17 = tpu.reciprocal %16 {approx = true} : vector<16x1xf32> -> vector<16x1xf32>
    %18 = arith.mulf %16, %17 : vector<16x1xf32>
    %cst_7 = arith.constant 2.000000e+00 : f32
    %19 = vector.broadcast %cst_7 : f32 to vector<16x1xf32>
    %20 = arith.subf %19, %18 : vector<16x1xf32>
    %21 = arith.mulf %17, %20 : vector<16x1xf32>
    %22 = vector.broadcast %21 : vector<16x1xf32> to vector<16x128xf32>
    %23 = arith.mulf %14, %22 : vector<16x128xf32>
    %cst_8 = arith.constant 5.000000e-03 : f32
    %24 = vector.broadcast %cst_8 : f32 to vector<16x128xf32>
    %25 = arith.subf %23, %24 : vector<16x128xf32>
    %cst_9 = arith.constant 0.000000e+00 : f32
    %26 = vector.broadcast %cst_9 : f32 to vector<16x128xf32>
    %27 = arith.maximumf %25, %26 : vector<16x128xf32>
    %28 = arith.mulf %23, %27 : vector<16x128xf32>
    %cst_10 = arith.constant 9.99999996E-13 : f32
    %29 = vector.broadcast %cst_10 : f32 to vector<16x128xf32>
    %30 = arith.addf %27, %29 : vector<16x128xf32>
    %31 = tpu.reciprocal %30 {approx = true} : vector<16x128xf32> -> vector<16x128xf32>
    %32 = arith.mulf %30, %31 : vector<16x128xf32>
    %cst_11 = arith.constant 2.000000e+00 : f32
    %33 = vector.broadcast %cst_11 : f32 to vector<16x128xf32>
    %34 = arith.subf %33, %32 : vector<16x128xf32>
    %35 = arith.mulf %31, %34 : vector<16x128xf32>
    %36 = arith.mulf %28, %35 : vector<16x128xf32>
    %cst_12 = arith.constant dense<0.000000e+00> : vector<16xf32>
    %37 = vector.multi_reduction <add>, %36, %cst_12 [1] : vector<16x128xf32> to vector<16xf32>
    %38 = vector.shape_cast %37 : vector<16xf32> to vector<16x1xf32>
    %cst_13 = arith.constant 9.99999996E-13 : f32
    %39 = vector.broadcast %cst_13 : f32 to vector<16x1xf32>
    %40 = arith.maximumf %38, %39 : vector<16x1xf32>
    %41 = tpu.reciprocal %40 {approx = true} : vector<16x1xf32> -> vector<16x1xf32>
    %42 = arith.mulf %40, %41 : vector<16x1xf32>
    %cst_14 = arith.constant 2.000000e+00 : f32
    %43 = vector.broadcast %cst_14 : f32 to vector<16x1xf32>
    %44 = arith.subf %43, %42 : vector<16x1xf32>
    %45 = arith.mulf %41, %44 : vector<16x1xf32>
    %46 = vector.broadcast %45 : vector<16x1xf32> to vector<16x128xf32>
    %47 = arith.mulf %36, %46 : vector<16x128xf32>
    %c0_15 = arith.constant 0 : index
    %c0_16 = arith.constant 0 : index
    %48 = vector.load %arg3[%c0_15, %c0_16] : memref<128x128xf32, #tpu.memory_space<vmem>>, vector<128x128xf32>
    %cst_17 = arith.constant dense<0.000000e+00> : vector<16x128xf32>
    %49 = tpu.matmul %47, %48, %cst_17 {dimension_numbers = #tpu.dot_dimension_numbers<[1], [0], [0], [1], [0, 0, 1, 1], [], []>} : vector<16x128xf32>, vector<128x128xf32>, vector<16x128xf32> -> vector<16x128xf32>
    %c0_18 = arith.constant 0 : index
    %c0_19 = arith.constant 0 : index
    %50 = vector.load %arg4[%c0_18, %c0_19] : memref<16x128xf32, #tpu.memory_space<vmem>>, vector<16x128xf32>
    tpu.vector_store %arg4[%c0_18, %c0_19], %49 {strides = array<i32>} : memref<16x128xf32, #tpu.memory_space<vmem>>, vector<16x128xf32>,
    return
  }
  func.func @transform_0(%arg0: i32) -> (i32, i32) {
    %c0_i32 = arith.constant 0 : i32
    %c0_i32_0 = arith.constant 0 : i32
    return %arg0, %c0_i32 : i32, i32
  }
  func.func @transform_1(%arg0: i32) -> (i32, i32) {
    %c0_i32 = arith.constant 0 : i32
    %c0_i32_0 = arith.constant 0 : i32
    %c0_i32_1 = arith.constant 0 : i32
    return %c0_i32, %c0_i32_0 : i32, i32
  }
  func.func @transform_2(%arg0: i32) -> (i32, i32) {
    %c0_i32 = arith.constant 0 : i32
    %c0_i32_0 = arith.constant 0 : i32
    %c0_i32_1 = arith.constant 0 : i32
    return %c0_i32, %c0_i32_0 : i32, i32
  }
  func.func @transform_3(%arg0: i32) -> (i32, i32) {
    %c0_i32 = arith.constant 0 : i32
    %c0_i32_0 = arith.constant 0 : i32
    return %arg0, %c0_i32 : i32, i32
  }
}

</mosaic_0001>

<bundles_post_ra>
// kernel: tpu_custom_call.1
= control target key start
LH: loop header
LB: loop body
LE: loop exit
PB: predicated region body
PF: predicated region fallthrough
CT: control target
= control target key end

     0   :  { %8 = vsyncpa [#allocation3], 0  ;;  %s1175_s0 = inlined_call_operand.hbm [shape: f32[32,128], index: 0, kind: input, shape index: {}]   ;;  %s1176_s1 = inlined_call_operand.hbm [shape: f32[128,128], index: 1, kind: input, shape index: {}]   ;;  %s1177_s2 = inlined_call_operand.hbm [shape: f32[128,128], index: 2, kind: input, shape index: {}]   ;;  %s1178_s3 = inlined_call_operand.hbm [shape: f32[32,128], index: 3, kind: output, shape index: {}]  }
   0x1   :  { %10 = vsyncpa [#allocation3 + $0x1], 0 }
   0x2   :  { %11 = vsyncpa [#allocation6], 0 }
   0x3   :  { %12 = vsyncpa [#allocation4], 0 }
   0x4   :  { %14 = vsyncpa [#allocation4 + $0x1], 0  ;;  %s970_s12 = smov 0   ;;  %s972_s13 = smov 0  }
   0x5   :  { %s974_s14 = smov 0   ;;  %s976_s15 = smov 0  }
   0x6 LB: > { %s991_s16 = sadd.s32 4294967295, %s940_s15   ;;  %s577_s17 = sadd.s32 4294967294, %s940_s15   ;;  %s940_s15 = sphi %s976_s15, %s1199_s15   ;;  %s936_s14 = sphi %s974_s14, %s1198_s14   ;;  %s932_s13 = sphi %s972_s13, %s1197_s13   ;;  %s928_s12 = sphi %s970_s12, %s1196_s12  }
   0x7   : > { %p40_p0 = scmp.ne.s32.totalorder %s932_s13, %s928_s12  ;;  %p1179_p1 = scmp.eq.s32.totalorder %s991_s16, 0 }
   0x8   : > { %p106_p2 = scmp.eq.s32.totalorder %s991_s16, 1  ;;  %p112_p3 = scmp.eq.s32.totalorder %s577_s17, 1 }
   0x9   : > { %p1000_p4 = por %p1179_p1, %p40_p0  ;;  %p578_p5 = scmp.ge.s32.totalorder %s940_s15, 1 }
   0xa   : > { %p1005_p6 = por %p112_p3, %p40_p0  ;;  %p119_p7 = scmp.lt.s32.totalorder %s940_s15, 3 }
   0xb   : > { %s1183_s18 = scalar_select %p1000_p4, 1, 0 }
   0xc   : > { %s1184_s19 = scalar_select %p1005_p6, 1, 0 }
   0xd   : > { %p1010_p8 = pnand %p578_p5, %p119_p7  ;;  %s942_s21 = smov [#allocation5]  }
   0xe   : > { %s131_s22 = sshll.u32 %s942_s21, 4  ;;  %s943_s24 = smov [#allocation7]   ;;  %s132_s22 = int_to_ptr.vmem [resolvable:$true] %s131_s22 }
   0xf   : > { %s1185_s20 = scalar_select %p1010_p8, 1, 0 }
  0x10   : > { %p717_p9 = pneg %p1010_p8  ;;  %s144_s25 = sshll.u32 %s943_s24, 4  ;;  %s145_s25 = int_to_ptr.vmem [resolvable:$true] %s144_s25 }
  0x11   : > { %s803_s26 = scalar_lea.vmem %s132_s22, 2048  ;;  %p811_p5 = scmp.lt.s32.totalorder %s132_s22, %s132_s22 }
  0x12   : > { %p1019_p11 = pnand %p717_p9, %p1179_p1  ;;  %p804_p13 = scmp.ne.s32.totalorder %s132_s22, %s803_s26 }
  0x13   : > { %p812_p7 = scmp.lt.s32.totalorder %s803_s26, %s803_s26 }
  0x14   : > { %p794_p12 = pneg %p1019_p11 }
  0x15   : > { %p813_p10 = por %p812_p7, %p811_p5 }
  0x16   : > { %p806_p0 = pnand %p804_p13, %p794_p12 }
  0x18   : > { %p807_p3 = pneg %p806_p0 }
  0x1a   : > { %p814_p9 = pnand %p813_p10, %p807_p3 }
  0x1c   : > { %817 = shalt.err (!%p814_p9)
}
  0x1d   : > { %s944_s27 = smov 128   ;;  %s945_s28 = smov 8  }
  0x1e   : > { %720 = dma.hbm_to_vmem [thread:$0]  (!%p1019_p11), %s1176_s1, 2048, %s132_s22, [#allocation6], %s944_s27, %s944_s27, %s945_s28  }
  0x1f   : > { %s829_s4 = scalar_lea.vmem %s145_s25, 2048  ;;  %p837_p10 = scmp.lt.s32.totalorder %s145_s25, %s145_s25 }
  0x20   : > { %p830_p13 = scmp.ne.s32.totalorder %s145_s25, %s829_s4  ;;  %p838_p3 = scmp.lt.s32.totalorder %s829_s4, %s829_s4 }
  0x22   : > { %p832_p0 = pnand %p830_p13, %p794_p12  ;;  %p839_p7 = por %p838_p3, %p837_p10 }
  0x24   : > { %p833_p5 = pneg %p832_p0 }
  0x26   : > { %p840_p9 = pnand %p839_p7, %p833_p5 }
  0x28   : > { %843 = shalt.err (!%p840_p9)
}
  0x29   : > { %723 = dma.hbm_to_vmem [thread:$0]  (!%p1019_p11), %s1177_s2, 2048, %s145_s25, [#allocation6], %s944_s27, %s944_s27, %s945_s28  }
  0x2a   : > { %s1048_s7 = sadd.s32 1, %s940_s15   ;;  %s27_s8 = sadd.s32 1, %s936_s14 }
  0x2b   : > { %s24_s9 = ssub.s32 %s940_s15, %s1048_s7  ;;  %p34_p12 = scmp.ne.s32.totalorder %s936_s14, %s932_s13 }
  0x2c   : > { %p25_p13 = scmp.eq.s32.totalorder %s24_s9, 0  ;;  %p35_p0 = scmp.eq.s32.totalorder %s940_s15, 0 }
  0x2d   : > { %p1058_p5 = por %p106_p2, %p34_p12  ;;  %p734_p10 = scmp.lt.s32.totalorder %s940_s15, 2 }
  0x2e   : > { %s1064_s11 = scalar_select %p25_p13, %s936_s14, %s27_s8  }
  0x2f   : > { %s1187_s10 = scalar_select %p1058_p5, 1, 0 }
  0x30   : > { %p36_p3 = por %p35_p0, %p34_p12  ;;  %s158_s17 = sand.u32 1, %s936_s14  }
  0x31   : > { %s582_s21 = sshll.u32 %s158_s17, 4  ;;  %s597_s22 = sshll.u32 %s940_s15, 8 }
  0x32   : > { %s1071_s25 = scalar_lea.hbm %s1175_s0, %s597_s22  ;;  %s162_s26 = scalar_lea.vmem [#allocation2], %s582_s21 }
  0x33   : > { %s169_s29 = sshll.u32 %s162_s26, 4  ;;  %p1075_p2 = pnand %p734_p10, %p36_p3  ;;  %s1073_s29 = int_to_ptr.vmem [resolvable:$true] %s169_s29 }
  0x34   : > { %s1079_s4 = scalar_lea.sflag [#allocation3], %s158_s17  ;;  %s844_s5 = scalar_lea.hbm %s1071_s25, 256 }
  0x35   : > { %p845_p11 = scmp.ne.s32.totalorder %s1071_s25, %s844_s5  ;;  %p846_p7 = pneg %p1075_p2 }
  0x36   : > { %s849_s9 = scalar_lea.hbm %s1175_s0, 512  ;;  %p850_p13 = scmp.lt.s32.totalorder %s1071_s25, %s1175_s0 }
  0x37   : > { %p847_p9 = pnand %p846_p7, %p845_p11  ;;  %p851_p0 = scmp.lt.s32.totalorder %s849_s9, %s844_s5 }
  0x39   : > { %p848_p12 = pneg %p847_p9  ;;  %p852_p10 = por %p851_p0, %p850_p13 }
  0x3b   : > { %p853_p3 = pnand %p852_p10, %p848_p12 }
  0x3d   : > { %856 = shalt.err (!%p853_p3)
}
  0x3e   : > { %s857_s17 = scalar_lea.vmem %s1073_s29, 256  ;;  %s946_s23 = smov [#allocation2]  }
  0x3f   : > { %p858_p1 = scmp.ne.s32.totalorder %s1073_s29, %s857_s17  ;;  %s862_s24 = sshll.u32 %s946_s23, 4  ;;  %s863_s24 = int_to_ptr.vmem [resolvable:$false] %s862_s24 }
  0x40   : > { %s864_s26 = scalar_lea.vmem %s863_s24, 512  ;;  %p865_p9 = scmp.lt.s32.totalorder %s1073_s29, %s863_s24 }
  0x41   : > { %p860_p6 = pnand %p858_p1, %p846_p7  ;;  %p866_p5 = scmp.lt.s32.totalorder %s864_s26, %s857_s17 }
  0x43   : > { %p861_p11 = pneg %p860_p6  ;;  %p867_p4 = por %p866_p5, %p865_p9 }
  0x45   : > { %p868_p8 = pnand %p867_p4, %p861_p11 }
  0x47   : > { %871 = shalt.err (!%p868_p8)
}
  0x48   : > { %727 = dma.hbm_to_vmem [thread:$0]  (!%p1075_p2), %s1071_s25, 256, %s1073_s29, %s1079_s4, %s944_s27, %s944_s27, %s945_s28  }
  0x49   : > { %p1189_p1 = scmp.ne.s32.totalorder %s1185_s20, 0 }
  0x4a   : > { %s1106_s5 = sand.u32 (!%p1189_p1), 1, %s932_s13   ;;  %p1190_p4 = scmp.ne.s32.totalorder (!%p1189_p1), %s1183_s18, 0 }
  0x4b   : > { %181 = sbr.rel (%p1189_p1) target bundleno = 1032 (0x408), region = 32  ;;  %s586_s6 = sshll.u32 (!%p1189_p1), %s1106_s5, 4 }
  0x4c   : > { %s184_s8 = scalar_lea.sflag (!%p1189_p1), [#allocation3], %s1106_s5  ;;  %s1112_s30 = scalar_lea.vmem (!%p1189_p1), [#allocation2], %s586_s6 }
  0x50   : > { %915 = dma.done.wait (%p1190_p4), %s184_s8, 256  }
  0x51   : > { %917 = vsyncadd (%p1190_p4), %s184_s8, 4294967040  ;;  %p1191_p6 = scmp.eq.s32.totalorder %s991_s16, 0 }
  0x53   : > { %919 = dma.done.wait (%p1191_p6), [#allocation6], 4096   ;;  %p1192_p8 = pmov %p1191_p6 }
  0x54   : > { %v239_v0 = vld [vmem:[#allocation5 + $0x78] sm:$0xff]  ;;  %v238_v1 = vld [vmem:[#allocation5 + $0x70] sm:$0xff]  ;;  %v237_v2 = vld [vmem:[#allocation5 + $0x68] sm:$0xff]  ;;  %v315_v20 = vlaneseq  ;;  %s217_s18 = scalar_lea.vmem [#allocation8], %s586_s6  ;;  %s598_s27 = sshll.u32 %s991_s16, 8 }
  0x55   : > { %921 = vsyncadd (%p1192_p8), [#allocation6], 4294963200  ;;  %635 = vmatprep.subr.mxu0 %v239_v0  ;;  %v236_v3 = vld [vmem:[#allocation5 + $0x60] sm:$0xff]  ;;  %v235_v5 = vld [vmem:[#allocation5 + $0x58] sm:$0xff]  ;;  %s485_s20 = sshll.u32 %s217_s18, 4  ;;  %s1132_s29 = scalar_lea.hbm %s1178_s3, %s598_s27  ;;  %s1127_s20 = int_to_ptr.vmem [resolvable:$true] %s485_s20 }
  0x56   : > { %636 = vmatpush3.msra.mxu0 %v239_v0  ;;  %v220_v4 = vld [vmem:[%s1112_s30] sm:$0xff]  ;;  %v233_v8 = vld [vmem:[#allocation5 + $0x48] sm:$0xff]  ;;  %v231_v10 = vld [vmem:[#allocation5 + $0x38] sm:$0xff]  ;;  %v316_v21 = vand.u32 127, %v315_v20  ;;  %s472_s4 = scalar_lea.sflag [#allocation4], %s1106_s5  ;;  %s872_s9 = scalar_lea.vmem %s1127_s20, 256 }
  0x57   : > { %637 = vmatprep.subr.mxu0 %v238_v1  ;;  %v222_v6 = vmul.f32 2.0, %v220_v4  ;;  %v234_v7 = vld [vmem:[#allocation5 + $0x50] sm:$0xff]  ;;  %v232_v9 = vld [vmem:[#allocation5 + $0x40] sm:$0xff]  ;;  %v229_v12 = vld [vmem:[#allocation5 + $0x28] sm:$0xff]  ;;  %p873_p5 = scmp.ne.s32.totalorder %s1127_s20, %s872_s9  ;;  %p1193_p2 = scmp.ne.s32.totalorder %s1187_s10, 0 }
  0x58   : > { %638 = vmatpush3.msra.mxu0 %v238_v1  ;;  %v230_v11 = vld [vmem:[#allocation5 + $0x30] sm:$0xff]  ;;  %v228_v13 = vld [vmem:[#allocation5 + $0x20] sm:$0xff]  ;;  %v227_v14 = vld [vmem:[#allocation5 + $0x18] sm:$0xff]  ;;  %vm317_vm0 = vcmp.lt.s32.totalorder %v316_v21, 64  ;;  %s947_s16 = smov [#allocation8]  }
  0x59   : > { %639 = vmatprep.subr.mxu0 %v237_v2  ;;  %667 = vmatprep.mubr.f32.mxu0 %v222_v6  ;;  %v226_v15 = vld [vmem:[#allocation5 + $0x10] sm:$0xff]  ;;  %v225_v16 = vld [vmem:[#allocation5 + $0x8] sm:$0xff]  ;;  %v224_v18 = vld [vmem:[#allocation5] sm:$0xff]  ;;  %p874_p7 = pnand %p873_p5, %p1193_p2  ;;  %s876_s21 = sshll.u32 %s947_s16, 4  ;;  %s877_s21 = int_to_ptr.vmem [resolvable:$false] %s876_s21 }
  0x5a   : > { %640 = vmatpush3.msra.mxu0 %v237_v2  ;;  %v221_v17 = vld [vmem:[%s1112_s30 + $0x8] sm:$0xff]  ;;  %v392_v35 = vld [vmem:[#allocation7 + $0x70] sm:$0xff]  ;;  %s878_s22 = scalar_lea.vmem %s877_s21, 512  ;;  %p879_p13 = scmp.lt.s32.totalorder %s1127_s20, %s877_s21 }
  0x5b   : > { %641 = vmatprep.subr.mxu0 %v236_v3  ;;  %v223_v19 = vmul.f32 2.0, %v221_v17  ;;  %v393_v34 = vld [vmem:[#allocation7 + $0x78] sm:$0xff]  ;;  %v391_v2 = vld [vmem:[#allocation7 + $0x68] sm:$0xff]  ;;  %p875_p12 = pneg %p874_p7  ;;  %p880_p0 = scmp.lt.s32.totalorder %s878_s22, %s872_s9 }
  0x5c   : > { %642 = vmatpush3.msra.mxu0 %v236_v3  ;;  %670 = vmatprep.subr.mxu1 %v393_v34  ;;  %v390_v3 = vld [vmem:[#allocation7 + $0x60] sm:$0xff]  ;;  %v389_v4 = vld [vmem:[#allocation7 + $0x58] sm:$0xff]  ;;  %v387_v6 = vld [vmem:[#allocation7 + $0x48] sm:$0xff] }
  0x5d   : > { %643 = vmatprep.subr.mxu0 %v235_v5  ;;  %671 = vmatpush3.msra.mxu1 %v393_v34  ;;  %p881_p10 = por %p880_p0, %p879_p13 }
  0x5e   : > { %644 = vmatpush3.msra.mxu0 %v235_v5  ;;  %672 = vmatprep.subr.mxu1 %v392_v35  ;;  %v388_v5 = vld [vmem:[#allocation7 + $0x50] sm:$0xff] }
  0x5f   : > { %645 = vmatprep.subr.mxu0 %v234_v7  ;;  %673 = vmatpush3.msra.mxu1 %v392_v35  ;;  %p882_p3 = pnand %p881_p10, %p875_p12 }
  0x60   : > { %646 = vmatpush3.msra.mxu0 %v234_v7  ;;  %674 = vmatprep.subr.mxu1 %v391_v2  ;;  %v386_v7 = vld [vmem:[#allocation7 + $0x40] sm:$0xff] }
  0x61   : > { %647 = vmatprep.subr.mxu0 %v233_v8  ;;  %675 = vmatpush3.msra.mxu1 %v391_v2 }
  0x62   : > { %648 = vmatpush3.msra.mxu0 %v233_v8  ;;  %676 = vmatprep.subr.mxu1 %v390_v3  ;;  %v385_v8 = vld [vmem:[#allocation7 + $0x38] sm:$0xff] }
  0x63   : > { %649 = vmatprep.subr.mxu0 %v232_v9  ;;  %677 = vmatpush3.msra.mxu1 %v390_v3 }
  0x64   : > { %650 = vmatpush3.msra.mxu0 %v232_v9  ;;  %678 = vmatprep.subr.mxu1 %v389_v4  ;;  %v384_v9 = vld [vmem:[#allocation7 + $0x30] sm:$0xff] }
  0x65   : > { %651 = vmatprep.subr.mxu0 %v231_v10  ;;  %679 = vmatpush3.msra.mxu1 %v389_v4 }
  0x66   : > { %652 = vmatpush3.msra.mxu0 %v231_v10  ;;  %680 = vmatprep.subr.mxu1 %v388_v5  ;;  %v383_v10 = vld [vmem:[#allocation7 + $0x28] sm:$0xff] }
  0x67   : > { %653 = vmatprep.subr.mxu0 %v230_v11  ;;  %681 = vmatpush3.msra.mxu1 %v388_v5 }
  0x68   : > { %654 = vmatpush3.msra.mxu0 %v230_v11  ;;  %682 = vmatprep.subr.mxu1 %v387_v6  ;;  %v382_v11 = vld [vmem:[#allocation7 + $0x20] sm:$0xff] }
  0x69   : > { %655 = vmatprep.subr.mxu0 %v229_v12  ;;  %683 = vmatpush3.msra.mxu1 %v387_v6 }
  0x6a   : > { %656 = vmatpush3.msra.mxu0 %v229_v12  ;;  %684 = vmatprep.subr.mxu1 %v386_v7  ;;  %v381_v12 = vld [vmem:[#allocation7 + $0x18] sm:$0xff] }
  0x6b   : > { %657 = vmatprep.subr.mxu0 %v228_v13  ;;  %685 = vmatpush3.msra.mxu1 %v386_v7 }
  0x6c   : > { %658 = vmatpush3.msra.mxu0 %v228_v13  ;;  %686 = vmatprep.subr.mxu1 %v385_v8  ;;  %v380_v13 = vld [vmem:[#allocation7 + $0x10] sm:$0xff] }
  0x6d   : > { %659 = vmatprep.subr.mxu0 %v227_v14  ;;  %687 = vmatpush3.msra.mxu1 %v385_v8 }
  0x6e   : > { %660 = vmatpush3.msra.mxu0 %v227_v14  ;;  %688 = vmatprep.subr.mxu1 %v384_v9  ;;  %v379_v14 = vld [vmem:[#allocation7 + $0x8] sm:$0xff] }
  0x6f   : > { %661 = vmatprep.subr.mxu0 %v226_v15  ;;  %689 = vmatpush3.msra.mxu1 %v384_v9 }
  0x70   : > { %662 = vmatpush3.msra.mxu0 %v226_v15  ;;  %690 = vmatprep.subr.mxu1 %v383_v10  ;;  %v378_v15 = vld [vmem:[#allocation7] sm:$0xff] }
  0x71   : > { %663 = vmatprep.subr.mxu0 %v225_v16  ;;  %691 = vmatpush3.msra.mxu1 %v383_v10 }
  0x72   : > { %664 = vmatpush3.msra.mxu0 %v225_v16  ;;  %692 = vmatprep.subr.mxu1 %v382_v11 }
  0x73   : > { %665 = vmatprep.subr.mxu0 %v224_v18  ;;  %693 = vmatpush3.msra.mxu1 %v382_v11 }
  0x74   : > { %666 = vmatpush3.msra.mxu0 %v224_v18  ;;  %694 = vmatprep.subr.mxu1 %v381_v12 }
  0x75   : > { %668 = vmatmul.mubr.f32.vlgmr.msra.gmra.mxu0 %v223_v19  ;;  %695 = vmatpush3.msra.mxu1 %v381_v12 }
  0x76   : > { %696 = vmatprep.subr.mxu1 %v380_v13 }
  0x77   : > { %697 = vmatpush3.msra.mxu1 %v380_v13 }
  0x78   : > { %698 = vmatprep.subr.mxu1 %v379_v14 }
  0x79   : > { %699 = vmatpush3.msra.mxu1 %v379_v14 }
  0x7a   : > { %700 = vmatprep.subr.mxu1 %v378_v15 }
  0x7b   : > { %701 = vmatpush3.msra.mxu1 %v378_v15 }
 0x135   : > { %v669_v22 = vpop.f32.mrf.mxu0 }
 0x136   : > { %v319_v25 = vsel %vm317_vm0, %v669_v22, -1e+30 }
 0x137   : > { %v306_v23 = vpop.f32.mrf.mxu0 }
 0x138   : > { %v318_v24 = vsel %vm317_vm0, %v306_v23, -1e+30 }
 0x139   : > { %320 = vmax.xlane.f32.xlu0 %v318_v24 }
 0x13d   : > { %322 = vmax.xlane.f32.xlu0 %v319_v25 }
 0x1c2   : > { %v321_v26 = vpop.xlane.xlu0 %320 }
 0x1c3   : > { %v324_v27 = vsub.f32 %v318_v24, %v321_v26 }
 0x1c5   : > { %v326_v28 = vmul.f32 1.442695, %v324_v27 }
 0x1c6   : > { %v323_v29 = vpop.xlane.xlu0 %322 }
 0x1c7   : > { %776 = vpow2.f32 %v326_v28  ;;  %v325_v30 = vsub.f32 %v319_v25, %v323_v29 }
 0x1c9   : > { %v328_v31 = vmul.f32 1.442695, %v325_v30 }
 0x1cb   : > { %778 = vpow2.f32 %v328_v31 }
 0x1d4   : > { %v777_v32 = vpop.eup %776 }
 0x1d5   : > { %330 = vadd.xlane.f32.xlu1 %v777_v32 }
 0x1d8   : > { %v779_v33 = vpop.eup %778 }
 0x1d9   : > { %332 = vadd.xlane.f32.xlu1 %v779_v33 }
 0x25e   : > { %v331_v36 = vpop.xlane.xlu1 %330 }
 0x25f   : > { %780 = vrcp.f32 %v331_v36 }
 0x262   : > { %v333_v37 = vpop.xlane.xlu1 %332 }
 0x263   : > { %782 = vrcp.f32 %v333_v37 }
 0x26c   : > { %v781_v38 = vpop.eup %780 }
 0x26d   : > { %v336_v39 = vmul.f32 %v781_v38, %v331_v36 }
 0x26f   : > { %v338_v40 = vsub.f32 2.0, %v336_v39 }
 0x270   : > { %v783_v41 = vpop.eup %782 }
 0x271   : > { %v340_v42 = vmul.f32 %v781_v38, %v338_v40  ;;  %v337_v43 = vmul.f32 %v783_v41, %v333_v37 }
 0x273   : > { %v339_v44 = vsub.f32 2.0, %v337_v43  ;;  %v342_v45 = vmul.f32 %v777_v32, %v340_v42 }
 0x275   : > { %v341_v46 = vmul.f32 %v783_v41, %v339_v44  ;;  %v590_v47 = vadd.f32 -0.005, %v342_v45 }
 0x277   : > { %v346_v48 = vmax.f32 %v590_v47, 0.0  ;;  %v343_v49 = vmul.f32 %v779_v33, %v341_v46 }
 0x279   : > { %v350_v50 = vadd.f32 1e-12, %v346_v48  ;;  %v591_v51 = vadd.f32 -0.005, %v343_v49  ;;  %v348_v58 = vmul.f32 %v346_v48, %v342_v45 }
 0x27b   : > { %784 = vrcp.f32 %v350_v50  ;;  %v347_v52 = vmax.f32 %v591_v51, 0.0 }
 0x27d   : > { %v351_v53 = vadd.f32 1e-12, %v347_v52  ;;  %v349_v63 = vmul.f32 %v347_v52, %v343_v49 }
 0x27f   : > { %786 = vrcp.f32 %v351_v53 }
 0x288   : > { %v785_v54 = vpop.eup %784 }
 0x289   : > { %v354_v55 = vmul.f32 %v785_v54, %v350_v50 }
 0x28b   : > { %v356_v56 = vsub.f32 2.0, %v354_v55 }
 0x28c   : > { %v787_v57 = vpop.eup %786 }
 0x28d   : > { %v358_v59 = vmul.f32 %v785_v54, %v356_v56  ;;  %v355_v60 = vmul.f32 %v787_v57, %v351_v53 }
 0x28f   : > { %v360_v61 = vmul.f32 %v358_v59, %v348_v58  ;;  %v357_v62 = vsub.f32 2.0, %v355_v60 }
 0x291   : > { %362 = vadd.xlane.f32.xlu0 %v360_v61  ;;  %v359_v0 = vmul.f32 %v787_v57, %v357_v62 }
 0x293   : > { %v361_v1 = vmul.f32 %v359_v0, %v349_v63 }
 0x295   : > { %364 = vadd.xlane.f32.xlu1 %v361_v1 }
 0x31a   : > { %v363_v16 = vpop.xlane.xlu0 %362 }
 0x31b   : > { %v366_v17 = vmax.f32 %v363_v16, 1e-12 }
 0x31d   : > { %788 = vrcp.f32 %v366_v17 }
 0x31e   : > { %v365_v18 = vpop.xlane.xlu1 %364 }
 0x31f   : > { %v367_v19 = vmax.f32 %v365_v18, 1e-12 }
 0x321   : > { %790 = vrcp.f32 %v367_v19 }
 0x32a   : > { %v789_v20 = vpop.eup %788 }
 0x32b   : > { %v370_v21 = vmul.f32 %v789_v20, %v366_v17 }
 0x32d   : > { %v372_v22 = vsub.f32 2.0, %v370_v21 }
 0x32e   : > { %v791_v23 = vpop.eup %790 }
 0x32f   : > { %v371_v24 = vmul.f32 %v791_v23, %v367_v19  ;;  %v374_v25 = vmul.f32 %v789_v20, %v372_v22 }
 0x331   : > { %v373_v26 = vsub.f32 2.0, %v371_v24  ;;  %v376_v27 = vmul.f32 %v374_v25, %v360_v61 }
 0x333   : > { %v375_v28 = vmul.f32 %v791_v23, %v373_v26  ;;  %702 = vmatprep.mubr.f32.mxu1 %v376_v27 }
 0x335   : > { %v377_v29 = vmul.f32 %v375_v28, %v361_v1 }
 0x337   : > { %703 = vmatmul.mubr.f32.vlgmr.msra.gmra.mxu1 %v377_v29 }
 0x3f7   : > { %v704_v30 = vpop.f32.mrf.mxu1 }
 0x3f8   : > { %470 = vst [vmem:[%s217_s18 + $0x8] sm:$0xff] %v704_v30 }
 0x3f9   : > { %v460_v31 = vpop.f32.mrf.mxu1 }
 0x3fa   : > { %469 = vst [vmem:[%s217_s18] sm:$0xff] %v460_v31 }
 0x3fb   : > { %885 = shalt.err (!%p882_p3)
}
 0x3fc   : > { %s886_s17 = scalar_lea.hbm %s1132_s29, 256  ;;  %s890_s26 = scalar_lea.hbm %s1178_s3, 512 }
 0x3fd   : > { %p887_p11 = scmp.ne.s32.totalorder %s1132_s29, %s886_s17  ;;  %p891_p4 = scmp.lt.s32.totalorder %s1132_s29, %s1178_s3 }
 0x3fe   : > { %p892_p6 = scmp.lt.s32.totalorder %s890_s26, %s886_s17 }
 0x3ff   : > { %p888_p9 = pnand %p887_p11, %p1193_p2 }
 0x400   : > { %p893_p8 = por %p892_p6, %p891_p4 }
 0x401   : > { %p889_p1 = pneg %p888_p9 }
 0x403   : > { %p894_p5 = pnand %p893_p8, %p889_p1 }
 0x405   : > { %897 = shalt.err (!%p894_p5)
}
 0x406   : > { %s948_s30 = smov 128   ;;  %s949_s18 = smov 8  }
 0x407   : > { %715 = dma.vmem_to_hbm [thread:$0]  (%p1193_p2), %s1127_s20, 256, %s1132_s29, %s472_s4, %s948_s30, %s948_s30, %s949_s18  }
 0x408 PF: > { %s500_s27 = sand.u32 1, %s928_s12   ;;  %p1194_p7 = scmp.ne.s32.totalorder %s1184_s19, 0 }
 0x409   : > { %p1195_p12 = scmp.ge.s32.totalorder %s940_s15, 2  ;;  %s501_s28 = scalar_lea.sflag [#allocation4], %s500_s27 }
 0x40b   : > { %p729_p13 = pnand %p1195_p12, %p1194_p7 }
 0x40d   : > { %p730_p0 = pneg %p729_p13 }
 0x40f   : > { %923 = dma.done.wait (%p730_p0), %s501_s28, 256  }
 0x410   : > { %925 = vsyncadd (%p730_p0), %s501_s28, 4294967040  ;;  %p17_p10 = scmp.ge.s32.totalorder %s1048_s7, 4   ;;  %s1196_s12 = smov %s932_s13 }
 0x411   : > { %s1197_s13 = smov %s936_s14  ;;  %s1198_s14 = smov %s1064_s11 }
 0x412   : > { %s1199_s15 = smov %s1048_s7  ;;  %19 = sbr.rel (!%p17_p10) target bundleno = 6 (0x6), region = 85 }
 0x417   :  { %506 = vsyncpa [#allocation3], 1 }
 0x418   :  { %508 = vsyncpa [#allocation3 + $0x1], 1 }
 0x419   :  { %509 = vsyncpa [#allocation6], 1 }
 0x41a   :  { %510 = vsyncpa [#allocation4], 1 }
 0x41b   :  { %512 = vsyncpa [#allocation4 + $0x1], 1 }

// kernel: tpu_custom_call.1
= control target key start
LH: loop header
LB: loop body
LE: loop exit
PB: predicated region body
PF: predicated region fallthrough
CT: control target
= control target key end

     0   :  { %8 = vsyncpa [#allocation3], 0  ;;  %s1175_s0 = inlined_call_operand.hbm [shape: f32[32,128], index: 0, kind: input, shape index: {}]   ;;  %s1176_s1 = inlined_call_operand.hbm [shape: f32[128,128], index: 1, kind: input, shape index: {}]   ;;  %s1177_s2 = inlined_call_operand.hbm [shape: f32[128,128], index: 2, kind: input, shape index: {}]   ;;  %s1178_s3 = inlined_call_operand.hbm [shape: f32[32,128], index: 3, kind: output, shape index: {}]  }
   0x1   :  { %10 = vsyncpa [#allocation3 + $0x1], 0 }
   0x2   :  { %11 = vsyncpa [#allocation6], 0 }
   0x3   :  { %12 = vsyncpa [#allocation4], 0 }
   0x4   :  { %14 = vsyncpa [#allocation4 + $0x1], 0  ;;  %s970_s12 = smov 0   ;;  %s972_s13 = smov 0  }
   0x5   :  { %s974_s14 = smov 0   ;;  %s976_s15 = smov 0  }
   0x6 LB: > { %s991_s16 = sadd.s32 4294967295, %s940_s15   ;;  %s577_s17 = sadd.s32 4294967294, %s940_s15   ;;  %s940_s15 = sphi %s976_s15, %s1199_s15   ;;  %s936_s14 = sphi %s974_s14, %s1198_s14   ;;  %s932_s13 = sphi %s972_s13, %s1197_s13   ;;  %s928_s12 = sphi %s970_s12, %s1196_s12  }
   0x7   : > { %p40_p0 = scmp.ne.s32.totalorder %s932_s13, %s928_s12  ;;  %p1179_p1 = scmp.eq.s32.totalorder %s991_s16, 0 }
   0x8   : > { %p106_p2 = scmp.eq.s32.totalorder %s991_s16, 1  ;;  %p112_p3 = scmp.eq.s32.totalorder %s577_s17, 1 }
   0x9   : > { %p1000_p4 = por %p1179_p1, %p40_p0  ;;  %p578_p5 = scmp.ge.s32.totalorder %s940_s15, 1 }
   0xa   : > { %p1005_p6 = por %p112_p3, %p40_p0  ;;  %p119_p7 = scmp.lt.s32.totalorder %s940_s15, 3 }
   0xb   : > { %s1183_s18 = scalar_select %p1000_p4, 1, 0 }
   0xc   : > { %s1184_s19 = scalar_select %p1005_p6, 1, 0 }
   0xd   : > { %p1010_p8 = pnand %p578_p5, %p119_p7  ;;  %s942_s21 = smov [#allocation5]  }
   0xe   : > { %s131_s22 = sshll.u32 %s942_s21, 4  ;;  %s943_s24 = smov [#allocation7]   ;;  %s132_s22 = int_to_ptr.vmem [resolvable:$true] %s131_s22 }
   0xf   : > { %s1185_s20 = scalar_select %p1010_p8, 1, 0 }
  0x10   : > { %p717_p9 = pneg %p1010_p8  ;;  %s144_s25 = sshll.u32 %s943_s24, 4  ;;  %s145_s25 = int_to_ptr.vmem [resolvable:$true] %s144_s25 }
  0x11   : > { %s803_s26 = scalar_lea.vmem %s132_s22, 2048  ;;  %p811_p5 = scmp.lt.s32.totalorder %s132_s22, %s132_s22 }
  0x12   : > { %p1019_p11 = pnand %p717_p9, %p1179_p1  ;;  %p804_p13 = scmp.ne.s32.totalorder %s132_s22, %s803_s26 }
  0x13   : > { %p812_p7 = scmp.lt.s32.totalorder %s803_s26, %s803_s26 }
  0x14   : > { %p794_p12 = pneg %p1019_p11 }
  0x15   : > { %p813_p10 = por %p812_p7, %p811_p5 }
  0x16   : > { %p806_p0 = pnand %p804_p13, %p794_p12 }
  0x18   : > { %p807_p3 = pneg %p806_p0 }
  0x1a   : > { %p814_p9 = pnand %p813_p10, %p807_p3 }
  0x1c   : > { %817 = shalt.err (!%p814_p9)
}
  0x1d   : > { %s944_s27 = smov 128   ;;  %s945_s28 = smov 8  }
  0x1e   : > { %720 = dma.hbm_to_vmem [thread:$0]  (!%p1019_p11), %s1176_s1, 2048, %s132_s22, [#allocation6], %s944_s27, %s944_s27, %s945_s28  }
  0x1f   : > { %s829_s4 = scalar_lea.vmem %s145_s25, 2048  ;;  %p837_p10 = scmp.lt.s32.totalorder %s145_s25, %s145_s25 }
  0x20   : > { %p830_p13 = scmp.ne.s32.totalorder %s145_s25, %s829_s4  ;;  %p838_p3 = scmp.lt.s32.totalorder %s829_s4, %s829_s4 }
  0x22   : > { %p832_p0 = pnand %p830_p13, %p794_p12  ;;  %p839_p7 = por %p838_p3, %p837_p10 }
  0x24   : > { %p833_p5 = pneg %p832_p0 }
  0x26   : > { %p840_p9 = pnand %p839_p7, %p833_p5 }
  0x28   : > { %843 = shalt.err (!%p840_p9)
}
  0x29   : > { %723 = dma.hbm_to_vmem [thread:$0]  (!%p1019_p11), %s1177_s2, 2048, %s145_s25, [#allocation6], %s944_s27, %s944_s27, %s945_s28  }
  0x2a   : > { %s1048_s7 = sadd.s32 1, %s940_s15   ;;  %s27_s8 = sadd.s32 1, %s936_s14 }
  0x2b   : > { %s24_s9 = ssub.s32 %s940_s15, %s1048_s7  ;;  %p34_p12 = scmp.ne.s32.totalorder %s936_s14, %s932_s13 }
  0x2c   : > { %p25_p13 = scmp.eq.s32.totalorder %s24_s9, 0  ;;  %p35_p0 = scmp.eq.s32.totalorder %s940_s15, 0 }
  0x2d   : > { %p1058_p5 = por %p106_p2, %p34_p12  ;;  %p734_p10 = scmp.lt.s32.totalorder %s940_s15, 2 }
  0x2e   : > { %s1064_s11 = scalar_select %p25_p13, %s936_s14, %s27_s8  }
  0x2f   : > { %s1187_s10 = scalar_select %p1058_p5, 1, 0 }
  0x30   : > { %p36_p3 = por %p35_p0, %p34_p12  ;;  %s158_s17 = sand.u32 1, %s936_s14  }
  0x31   : > { %s582_s21 = sshll.u32 %s158_s17, 4  ;;  %s597_s22 = sshll.u32 %s940_s15, 8 }
  0x32   : > { %s1071_s25 = scalar_lea.hbm %s1175_s0, %s597_s22  ;;  %s162_s26 = scalar_lea.vmem [#allocation2], %s582_s21 }
  0x33   : > { %s169_s29 = sshll.u32 %s162_s26, 4  ;;  %p1075_p2 = pnand %p734_p10, %p36_p3  ;;  %s1073_s29 = int_to_ptr.vmem [resolvable:$true] %s169_s29 }
  0x34   : > { %s1079_s4 = scalar_lea.sflag [#allocation3], %s158_s17  ;;  %s844_s5 = scalar_lea.hbm %s1071_s25, 256 }
  0x35   : > { %p845_p11 = scmp.ne.s32.totalorder %s1071_s25, %s844_s5  ;;  %p846_p7 = pneg %p1075_p2 }
  0x36   : > { %s849_s9 = scalar_lea.hbm %s1175_s0, 512  ;;  %p850_p13 = scmp.lt.s32.totalorder %s1071_s25, %s1175_s0 }
  0x37   : > { %p847_p9 = pnand %p846_p7, %p845_p11  ;;  %p851_p0 = scmp.lt.s32.totalorder %s849_s9, %s844_s5 }
  0x39   : > { %p848_p12 = pneg %p847_p9  ;;  %p852_p10 = por %p851_p0, %p850_p13 }
  0x3b   : > { %p853_p3 = pnand %p852_p10, %p848_p12 }
  0x3d   : > { %856 = shalt.err (!%p853_p3)
}
  0x3e   : > { %s857_s17 = scalar_lea.vmem %s1073_s29, 256  ;;  %s946_s23 = smov [#allocation2]  }
  0x3f   : > { %p858_p1 = scmp.ne.s32.totalorder %s1073_s29, %s857_s17  ;;  %s862_s24 = sshll.u32 %s946_s23, 4  ;;  %s863_s24 = int_to_ptr.vmem [resolvable:$false] %s862_s24 }
  0x40   : > { %s864_s26 = scalar_lea.vmem %s863_s24, 512  ;;  %p865_p9 = scmp.lt.s32.totalorder %s1073_s29, %s863_s24 }
  0x41   : > { %p860_p6 = pnand %p858_p1, %p846_p7  ;;  %p866_p5 = scmp.lt.s32.totalorder %s864_s26, %s857_s17 }
  0x43   : > { %p861_p11 = pneg %p860_p6  ;;  %p867_p4 = por %p866_p5, %p865_p9 }
  0x45   : > { %p868_p8 = pnand %p867_p4, %p861_p11 }
  0x47   : > { %871 = shalt.err (!%p868_p8)
}
  0x48   : > { %727 = dma.hbm_to_vmem [thread:$0]  (!%p1075_p2), %s1071_s25, 256, %s1073_s29, %s1079_s4, %s944_s27, %s944_s27, %s945_s28  }
  0x49   : > { %p1189_p1 = scmp.ne.s32.totalorder %s1185_s20, 0 }
  0x4a   : > { %s1106_s5 = sand.u32 (!%p1189_p1), 1, %s932_s13   ;;  %p1190_p4 = scmp.ne.s32.totalorder (!%p1189_p1), %s1183_s18, 0 }
  0x4b   : > { %181 = sbr.rel (%p1189_p1) target bundleno = 1032 (0x408), region = 32  ;;  %s586_s6 = sshll.u32 (!%p1189_p1), %s1106_s5, 4 }
  0x4c   : > { %s184_s8 = scalar_lea.sflag (!%p1189_p1), [#allocation3], %s1106_s5  ;;  %s1112_s30 = scalar_lea.vmem (!%p1189_p1), [#allocation2], %s586_s6 }
  0x50   : > { %915 = dma.done.wait (%p1190_p4), %s184_s8, 256  }
  0x51   : > { %917 = vsyncadd (%p1190_p4), %s184_s8, 4294967040  ;;  %p1191_p6 = scmp.eq.s32.totalorder %s991_s16, 0 }
  0x53   : > { %919 = dma.done.wait (%p1191_p6), [#allocation6], 4096   ;;  %p1192_p8 = pmov %p1191_p6 }
  0x54   : > { %v239_v0 = vld [vmem:[#allocation5 + $0x78] sm:$0xff]  ;;  %v238_v1 = vld [vmem:[#allocation5 + $0x70] sm:$0xff]  ;;  %v237_v2 = vld [vmem:[#allocation5 + $0x68] sm:$0xff]  ;;  %v315_v20 = vlaneseq  ;;  %s217_s18 = scalar_lea.vmem [#allocation8], %s586_s6  ;;  %s598_s27 = sshll.u32 %s991_s16, 8 }
  0x55   : > { %921 = vsyncadd (%p1192_p8), [#allocation6], 4294963200  ;;  %635 = vmatprep.subr.mxu0 %v239_v0  ;;  %v236_v3 = vld [vmem:[#allocation5 + $0x60] sm:$0xff]  ;;  %v235_v5 = vld [vmem:[#allocation5 + $0x58] sm:$0xff]  ;;  %s485_s20 = sshll.u32 %s217_s18, 4  ;;  %s1132_s29 = scalar_lea.hbm %s1178_s3, %s598_s27  ;;  %s1127_s20 = int_to_ptr.vmem [resolvable:$true] %s485_s20 }
  0x56   : > { %636 = vmatpush3.msra.mxu0 %v239_v0  ;;  %v220_v4 = vld [vmem:[%s1112_s30] sm:$0xff]  ;;  %v233_v8 = vld [vmem:[#allocation5 + $0x48] sm:$0xff]  ;;  %v231_v10 = vld [vmem:[#allocation5 + $0x38] sm:$0xff]  ;;  %v316_v21 = vand.u32 127, %v315_v20  ;;  %s472_s4 = scalar_lea.sflag [#allocation4], %s1106_s5  ;;  %s872_s9 = scalar_lea.vmem %s1127_s20, 256 }
  0x57   : > { %637 = vmatprep.subr.mxu0 %v238_v1  ;;  %v222_v6 = vmul.f32 2.0, %v220_v4  ;;  %v234_v7 = vld [vmem:[#allocation5 + $0x50] sm:$0xff]  ;;  %v232_v9 = vld [vmem:[#allocation5 + $0x40] sm:$0xff]  ;;  %v229_v12 = vld [vmem:[#allocation5 + $0x28] sm:$0xff]  ;;  %p873_p5 = scmp.ne.s32.totalorder %s1127_s20, %s872_s9  ;;  %p1193_p2 = scmp.ne.s32.totalorder %s1187_s10, 0 }
  0x58   : > { %638 = vmatpush3.msra.mxu0 %v238_v1  ;;  %v230_v11 = vld [vmem:[#allocation5 + $0x30] sm:$0xff]  ;;  %v228_v13 = vld [vmem:[#allocation5 + $0x20] sm:$0xff]  ;;  %v227_v14 = vld [vmem:[#allocation5 + $0x18] sm:$0xff]  ;;  %vm317_vm0 = vcmp.lt.s32.totalorder %v316_v21, 64  ;;  %s947_s16 = smov [#allocation8]  }
  0x59   : > { %639 = vmatprep.subr.mxu0 %v237_v2  ;;  %667 = vmatprep.mubr.f32.mxu0 %v222_v6  ;;  %v226_v15 = vld [vmem:[#allocation5 + $0x10] sm:$0xff]  ;;  %v225_v16 = vld [vmem:[#allocation5 + $0x8] sm:$0xff]  ;;  %v224_v18 = vld [vmem:[#allocation5] sm:$0xff]  ;;  %p874_p7 = pnand %p873_p5, %p1193_p2  ;;  %s876_s21 = sshll.u32 %s947_s16, 4  ;;  %s877_s21 = int_to_ptr.vmem [resolvable:$false] %s876_s21 }
  0x5a   : > { %640 = vmatpush3.msra.mxu0 %v237_v2  ;;  %v221_v17 = vld [vmem:[%s1112_s30 + $0x8] sm:$0xff]  ;;  %v392_v35 = vld [vmem:[#allocation7 + $0x70] sm:$0xff]  ;;  %s878_s22 = scalar_lea.vmem %s877_s21, 512  ;;  %p879_p13 = scmp.lt.s32.totalorder %s1127_s20, %s877_s21 }
  0x5b   : > { %641 = vmatprep.subr.mxu0 %v236_v3  ;;  %v223_v19 = vmul.f32 2.0, %v221_v17  ;;  %v393_v34 = vld [vmem:[#allocation7 + $0x78] sm:$0xff]  ;;  %v391_v2 = vld [vmem:[#allocation7 + $0x68] sm:$0xff]  ;;  %p875_p12 = pneg %p874_p7  ;;  %p880_p0 = scmp.lt.s32.totalorder %s878_s22, %s872_s9 }
  0x5c   : > { %642 = vmatpush3.msra.mxu0 %v236_v3  ;;  %670 = vmatprep.subr.mxu1 %v393_v34  ;;  %v390_v3 = vld [vmem:[#allocation7 + $0x60] sm:$0xff]  ;;  %v389_v4 = vld [vmem:[#allocation7 + $0x58] sm:$0xff]  ;;  %v387_v6 = vld [vmem:[#allocation7 + $0x48] sm:$0xff] }
  0x5d   : > { %643 = vmatprep.subr.mxu0 %v235_v5  ;;  %671 = vmatpush3.msra.mxu1 %v393_v34  ;;  %p881_p10 = por %p880_p0, %p879_p13 }
  0x5e   : > { %644 = vmatpush3.msra.mxu0 %v235_v5  ;;  %672 = vmatprep.subr.mxu1 %v392_v35  ;;  %v388_v5 = vld [vmem:[#allocation7 + $0x50] sm:$0xff] }
  0x5f   : > { %645 = vmatprep.subr.mxu0 %v234_v7  ;;  %673 = vmatpush3.msra.mxu1 %v392_v35  ;;  %p882_p3 = pnand %p881_p10, %p875_p12 }
  0x60   : > { %646 = vmatpush3.msra.mxu0 %v234_v7  ;;  %674 = vmatprep.subr.mxu1 %v391_v2  ;;  %v386_v7 = vld [vmem:[#allocation7 + $0x40] sm:$0xff] }
  0x61   : > { %647 = vmatprep.subr.mxu0 %v233_v8  ;;  %675 = vmatpush3.msra.mxu1 %v391_v2 }
  0x62   : > { %648 = vmatpush3.msra.mxu0 %v233_v8  ;;  %676 = vmatprep.subr.mxu1 %v390_v3  ;;  %v385_v8 = vld [vmem:[#allocation7 + $0x38] sm:$0xff] }
  0x63   : > { %649 = vmatprep.subr.mxu0 %v232_v9  ;;  %677 = vmatpush3.msra.mxu1 %v390_v3 }
  0x64   : > { %650 = vmatpush3.msra.mxu0 %v232_v9  ;;  %678 = vmatprep.subr.mxu1 %v389_v4  ;;  %v384_v9 = vld [vmem:[#allocation7 + $0x30] sm:$0xff] }
  0x65   : > { %651 = vmatprep.subr.mxu0 %v231_v10  ;;  %679 = vmatpush3.msra.mxu1 %v389_v4 }
  0x66   : > { %652 = vmatpush3.msra.mxu0 %v231_v10  ;;  %680 = vmatprep.subr.mxu1 %v388_v5  ;;  %v383_v10 = vld [vmem:[#allocation7 + $0x28] sm:$0xff] }
  0x67   : > { %653 = vmatprep.subr.mxu0 %v230_v11  ;;  %681 = vmatpush3.msra.mxu1 %v388_v5 }
  0x68   : > { %654 = vmatpush3.msra.mxu0 %v230_v11  ;;  %682 = vmatprep.subr.mxu1 %v387_v6  ;;  %v382_v11 = vld [vmem:[#allocation7 + $0x20] sm:$0xff] }
  0x69   : > { %655 = vmatprep.subr.mxu0 %v229_v12  ;;  %683 = vmatpush3.msra.mxu1 %v387_v6 }
  0x6a   : > { %656 = vmatpush3.msra.mxu0 %v229_v12  ;;  %684 = vmatprep.subr.mxu1 %v386_v7  ;;  %v381_v12 = vld [vmem:[#allocation7 + $0x18] sm:$0xff] }
  0x6b   : > { %657 = vmatprep.subr.mxu0 %v228_v13  ;;  %685 = vmatpush3.msra.mxu1 %v386_v7 }
  0x6c   : > { %658 = vmatpush3.msra.mxu0 %v228_v13  ;;  %686 = vmatprep.subr.mxu1 %v385_v8  ;;  %v380_v13 = vld [vmem:[#allocation7 + $0x10] sm:$0xff] }
  0x6d   : > { %659 = vmatprep.subr.mxu0 %v227_v14  ;;  %687 = vmatpush3.msra.mxu1 %v385_v8 }
  0x6e   : > { %660 = vmatpush3.msra.mxu0 %v227_v14  ;;  %688 = vmatprep.subr.mxu1 %v384_v9  ;;  %v379_v14 = vld [vmem:[#allocation7 + $0x8] sm:$0xff] }
  0x6f   : > { %661 = vmatprep.subr.mxu0 %v226_v15  ;;  %689 = vmatpush3.msra.mxu1 %v384_v9 }
  0x70   : > { %662 = vmatpush3.msra.mxu0 %v226_v15  ;;  %690 = vmatprep.subr.mxu1 %v383_v10  ;;  %v378_v15 = vld [vmem:[#allocation7] sm:$0xff] }
  0x71   : > { %663 = vmatprep.subr.mxu0 %v225_v16  ;;  %691 = vmatpush3.msra.mxu1 %v383_v10 }
  0x72   : > { %664 = vmatpush3.msra.mxu0 %v225_v16  ;;  %692 = vmatprep.subr.mxu1 %v382_v11 }
  0x73   : > { %665 = vmatprep.subr.mxu0 %v224_v18  ;;  %693 = vmatpush3.msra.mxu1 %v382_v11 }
  0x74   : > { %666 = vmatpush3.msra.mxu0 %v224_v18  ;;  %694 = vmatprep.subr.mxu1 %v381_v12 }
  0x75   : > { %668 = vmatmul.mubr.f32.vlgmr.msra.gmra.mxu0 %v223_v19  ;;  %695 = vmatpush3.msra.mxu1 %v381_v12 }
  0x76   : > { %696 = vmatprep.subr.mxu1 %v380_v13 }
  0x77   : > { %697 = vmatpush3.msra.mxu1 %v380_v13 }
  0x78   : > { %698 = vmatprep.subr.mxu1 %v379_v14 }
  0x79   : > { %699 = vmatpush3.msra.mxu1 %v379_v14 }
  0x7a   : > { %700 = vmatprep.subr.mxu1 %v378_v15 }
  0x7b   : > { %701 = vmatpush3.msra.mxu1 %v378_v15 }
 0x135   : > { %v669_v22 = vpop.f32.mrf.mxu0 }
 0x136   : > { %v319_v25 = vsel %vm317_vm0, %v669_v22, -1e+30 }
 0x137   : > { %v306_v23 = vpop.f32.mrf.mxu0 }
 0x138   : > { %v318_v24 = vsel %vm317_vm0, %v306_v23, -1e+30 }
 0x139   : > { %320 = vmax.xlane.f32.xlu0 %v318_v24 }
 0x13d   : > { %322 = vmax.xlane.f32.xlu0 %v319_v25 }
 0x1c2   : > { %v321_v26 = vpop.xlane.xlu0 %320 }
 0x1c3   : > { %v324_v27 = vsub.f32 %v318_v24, %v321_v26 }
 0x1c5   : > { %v326_v28 = vmul.f32 1.442695, %v324_v27 }
 0x1c6   : > { %v323_v29 = vpop.xlane.xlu0 %322 }
 0x1c7   : > { %776 = vpow2.f32 %v326_v28  ;;  %v325_v30 = vsub.f32 %v319_v25, %v323_v29 }
 0x1c9   : > { %v328_v31 = vmul.f32 1.442695, %v325_v30 }
 0x1cb   : > { %778 = vpow2.f32 %v328_v31 }
 0x1d4   : > { %v777_v32 = vpop.eup %776 }
 0x1d5   : > { %330 = vadd.xlane.f32.xlu1 %v777_v32 }
 0x1d8   : > { %v779_v33 = vpop.eup %778 }
 0x1d9   : > { %332 = vadd.xlane.f32.xlu1 %v779_v33 }
 0x25e   : > { %v331_v36 = vpop.xlane.xlu1 %330 }
 0x25f   : > { %780 = vrcp.f32 %v331_v36 }
 0x262   : > { %v333_v37 = vpop.xlane.xlu1 %332 }
 0x263   : > { %782 = vrcp.f32 %v333_v37 }
 0x26c   : > { %v781_v38 = vpop.eup %780 }
 0x26d   : > { %v336_v39 = vmul.f32 %v781_v38, %v331_v36 }
 0x26f   : > { %v338_v40 = vsub.f32 2.0, %v336_v39 }
 0x270   : > { %v783_v41 = vpop.eup %782 }
 0x271   : > { %v340_v42 = vmul.f32 %v781_v38, %v338_v40  ;;  %v337_v43 = vmul.f32 %v783_v41, %v333_v37 }
 0x273   : > { %v339_v44 = vsub.f32 2.0, %v337_v43  ;;  %v342_v45 = vmul.f32 %v777_v32, %v340_v42 }
 0x275   : > { %v341_v46 = vmul.f32 %v783_v41, %v339_v44  ;;  %v590_v47 = vadd.f32 -0.005, %v342_v45 }
 0x277   : > { %v346_v48 = vmax.f32 %v590_v47, 0.0  ;;  %v343_v49 = vmul.f32 %v779_v33, %v341_v46 }
 0x279   : > { %v350_v50 = vadd.f32 1e-12, %v346_v48  ;;  %v591_v51 = vadd.f32 -0.005, %v343_v49  ;;  %v348_v58 = vmul.f32 %v346_v48, %v342_v45 }
 0x27b   : > { %784 = vrcp.f32 %v350_v50  ;;  %v347_v52 = vmax.f32 %v591_v51, 0.0 }
 0x27d   : > { %v351_v53 = vadd.f32 1e-12, %v347_v52  ;;  %v349_v63 = vmul.f32 %v347_v52, %v343_v49 }
 0x27f   : > { %786 = vrcp.f32 %v351_v53 }
 0x288   : > { %v785_v54 = vpop.eup %784 }
 0x289   : > { %v354_v55 = vmul.f32 %v785_v54, %v350_v50 }
 0x28b   : > { %v356_v56 = vsub.f32 2.0, %v354_v55 }
 0x28c   : > { %v787_v57 = vpop.eup %786 }
 0x28d   : > { %v358_v59 = vmul.f32 %v785_v54, %v356_v56  ;;  %v355_v60 = vmul.f32 %v787_v57, %v351_v53 }
 0x28f   : > { %v360_v61 = vmul.f32 %v358_v59, %v348_v58  ;;  %v357_v62 = vsub.f32 2.0, %v355_v60 }
 0x291   : > { %362 = vadd.xlane.f32.xlu0 %v360_v61  ;;  %v359_v0 = vmul.f32 %v787_v57, %v357_v62 }
 0x293   : > { %v361_v1 = vmul.f32 %v359_v0, %v349_v63 }
 0x295   : > { %364 = vadd.xlane.f32.xlu1 %v361_v1 }
 0x31a   : > { %v363_v16 = vpop.xlane.xlu0 %362 }
 0x31b   : > { %v366_v17 = vmax.f32 %v363_v16, 1e-12 }
 0x31d   : > { %788 = vrcp.f32 %v366_v17 }
 0x31e   : > { %v365_v18 = vpop.xlane.xlu1 %364 }
 0x31f   : > { %v367_v19 = vmax.f32 %v365_v18, 1e-12 }
 0x321   : > { %790 = vrcp.f32 %v367_v19 }
 0x32a   : > { %v789_v20 = vpop.eup %788 }
 0x32b   : > { %v370_v21 = vmul.f32 %v789_v20, %v366_v17 }
 0x32d   : > { %v372_v22 = vsub.f32 2.0, %v370_v21 }
 0x32e   : > { %v791_v23 = vpop.eup %790 }
 0x32f   : > { %v371_v24 = vmul.f32 %v791_v23, %v367_v19  ;;  %v374_v25 = vmul.f32 %v789_v20, %v372_v22 }
 0x331   : > { %v373_v26 = vsub.f32 2.0, %v371_v24  ;;  %v376_v27 = vmul.f32 %v374_v25, %v360_v61 }
 0x333   : > { %v375_v28 = vmul.f32 %v791_v23, %v373_v26  ;;  %702 = vmatprep.mubr.f32.mxu1 %v376_v27 }
 0x335   : > { %v377_v29 = vmul.f32 %v375_v28, %v361_v1 }
 0x337   : > { %703 = vmatmul.mubr.f32.vlgmr.msra.gmra.mxu1 %v377_v29 }
 0x3f7   : > { %v704_v30 = vpop.f32.mrf.mxu1 }
 0x3f8   : > { %470 = vst [vmem:[%s217_s18 + $0x8] sm:$0xff] %v704_v30 }
 0x3f9   : > { %v460_v31 = vpop.f32.mrf.mxu1 }
 0x3fa   : > { %469 = vst [vmem:[%s217_s18] sm:$0xff] %v460_v31 }
 0x3fb   : > { %885 = shalt.err (!%p882_p3)
}
 0x3fc   : > { %s886_s17 = scalar_lea.hbm %s1132_s29, 256  ;;  %s890_s26 = scalar_lea.hbm %s1178_s3, 512 }
 0x3fd   : > { %p887_p11 = scmp.ne.s32.totalorder %s1132_s29, %s886_s17  ;;  %p891_p4 = scmp.lt.s32.totalorder %s1132_s29, %s1178_s3 }
 0x3fe   : > { %p892_p6 = scmp.lt.s32.totalorder %s890_s26, %s886_s17 }
 0x3ff   : > { %p888_p9 = pnand %p887_p11, %p1193_p2 }
 0x400   : > { %p893_p8 = por %p892_p6, %p891_p4 }
 0x401   : > { %p889_p1 = pneg %p888_p9 }
 0x403   : > { %p894_p5 = pnand %p893_p8, %p889_p1 }
 0x405   : > { %897 = shalt.err (!%p894_p5)
}
 0x406   : > { %s948_s30 = smov 128   ;;  %s949_s18 = smov 8  }
 0x407   : > { %715 = dma.vmem_to_hbm [thread:$0]  (%p1193_p2), %s1127_s20, 256, %s1132_s29, %s472_s4, %s948_s30, %s948_s30, %s949_s18  }
 0x408 PF: > { %s500_s27 = sand.u32 1, %s928_s12   ;;  %p1194_p7 = scmp.ne.s32.totalorder %s1184_s19, 0 }
 0x409   : > { %p1195_p12 = scmp.ge.s32.totalorder %s940_s15, 2  ;;  %s501_s28 = scalar_lea.sflag [#allocation4], %s500_s27 }
 0x40b   : > { %p729_p13 = pnand %p1195_p12, %p1194_p7 }
 0x40d   : > { %p730_p0 = pneg %p729_p13 }
 0x40f   : > { %923 = dma.done.wait (%p730_p0), %s501_s28, 256  }
 0x410   : > { %925 = vsyncadd (%p730_p0), %s501_s28, 4294967040  ;;  %p17_p10 = scmp.ge.s32.totalorder %s1048_s7, 4   ;;  %s1196_s12 = smov %s932_s13 }
 0x411   : > { %s1197_s13 = smov %s936_s14  ;;  %s1198_s14 = smov %s1064_s11 }
 0x412   : > { %s1199_s15 = smov %s1048_s7  ;;  %19 = sbr.rel (!%p17_p10) target bundleno = 6 (0x6), region = 85 }
 0x417   :  { %506 = vsyncpa [#allocation3], 1 }
 0x418   :  { %508 = vsyncpa [#allocation3 + $0x1], 1 }
 0x419   :  { %509 = vsyncpa [#allocation6], 1 }
 0x41a   :  { %510 = vsyncpa [#allocation4], 1 }
 0x41b   :  { %512 = vsyncpa [#allocation4 + $0x1], 1 }

</bundles_post_ra>
